<compile_context>
chip_gen: v7x
topology: tpu7x:2x2x1
jax: 0.10.0
libtpu: 0.0.40
codegen_flags: <defaults>
</compile_context>

<pallas_src>
import jax
import jax.numpy as jnp
from jax.experimental import pallas as pl
from jax.experimental.pallas import tpu as pltpu


def cin_kernel(x0_ref, xk_ref, w_ref, b_ref, o_ref):
    # x0_ref: (B, m, D)   xk_ref: (B, hk_pad, D)
    # w_ref : (out_c, m*hk_pad)   b_ref: (out_c, 1)   o_ref: (B, out_c, D)
    x0 = x0_ref[...]
    xk = xk_ref[...]
    w = w_ref[...]

    bblk, m, d = x0.shape
    hk_pad = xk.shape[1]
    out_c = w.shape[0]

    # Flattened outer product: cubic[b, i*hk_pad + j, d] = x0[b,i,d] * xk[b,j,d].
    # hk_pad is a multiple of 8 (sublane), so this reshape is layout-free.
    cubic = (x0[:, :, None, :] * xk[:, None, :, :]).reshape(bblk, m * hk_pad, d)

    # Single batched MXU contraction over the m*hk_pad channel axis
    # (padded W columns multiply zero-padded xk rows -> no effect on result).
    wb = jnp.broadcast_to(w[None, :, :], (bblk, out_c, m * hk_pad))
    res = jnp.einsum('boc,bcd->bod', wb, cubic,
                     preferred_element_type=jnp.float32)

    res = res + b_ref[...][None, :, :]            # (out_c, 1) bias, broadcast over D
    o_ref[...] = res.astype(o_ref.dtype)


def cin_layer(x0, xk, w, b, *, batch_block=256):
    """x0: (bs, m, D), xk: (bs, hk, D), w: (out_c, m*hk), b: (out_c,)
    -> (bs, out_c, D); equivalent to Conv1d(m*hk, out_c, 1)(outer-product map)."""
    bs, m, d = x0.shape
    _, hk, _ = xk.shape
    out_c = w.shape[0]
    assert w.shape == (out_c, m * hk)

    # --- wrapper-side padding (done once, by XLA) ---------------------------
    # Pad hk -> multiple of 8 so the in-kernel reshape stays sublane-aligned.
    hk_pad = max(8, -(-hk // 8) * 8)
    if hk_pad != hk:
        xk = jnp.pad(xk, ((0, 0), (0, hk_pad - hk), (0, 0)))
        w = jnp.pad(w.reshape(out_c, m, hk),
                    ((0, 0), (0, 0), (0, hk_pad - hk))).reshape(out_c, m * hk_pad)

    # Tile the batch; pad it to a multiple of the block so each step is full.
    bblk = min(batch_block, bs)
    n_blocks = pl.cdiv(bs, bblk)
    bs_pad = n_blocks * bblk
    if bs_pad != bs:
        x0 = jnp.pad(x0, ((0, bs_pad - bs), (0, 0), (0, 0)))
        xk = jnp.pad(xk, ((0, bs_pad - bs), (0, 0), (0, 0)))

    b2 = b.reshape(out_c, 1)

    # TODO(synk): if production D is not a multiple of 128 (e.g. 16/32/64),
    # fold batch into the lane axis in the wrapper to keep stores lane-dense.
    out = pl.pallas_call(
        cin_kernel,
        out_shape=jax.ShapeDtypeStruct((bs_pad, out_c, d), x0.dtype),
        grid_spec=pltpu.PrefetchScalarGridSpec(
            num_scalar_prefetch=0,
            grid=(n_blocks,),
            in_specs=[
                pl.BlockSpec((bblk, m, d), lambda bi: (bi, 0, 0)),
                pl.BlockSpec((bblk, hk_pad, d), lambda bi: (bi, 0, 0)),
                # Weights / bias: constant index_map -> resident in VMEM.
                pl.BlockSpec((out_c, m * hk_pad), lambda bi: (0, 0)),
                pl.BlockSpec((out_c, 1), lambda bi: (0, 0)),
            ],
            out_specs=pl.BlockSpec((bblk, out_c, d), lambda bi: (bi, 0, 0)),
        ),
        compiler_params=pltpu.CompilerParams(
            dimension_semantics=("parallel",),
            # batch_block<=512 at D=128/f32 fits well under this, leaving
            # headroom on v7x's 64 MiB VMEM (safe on v5e/v6e's 128 MiB too).
            vmem_limit_bytes=48 * 1024 * 1024,
        ),
    )(x0, xk, w, b2)

    return out[:bs] if bs_pad != bs else out


def cin_reference(x0, xk, w, b):
    # Pure-JAX reference of the PyTorch forward.
    bs, m, d = x0.shape
    hk = xk.shape[1]
    cubic = x0[:, :, None, :] * xk[:, None, :, :]          # (bs, m, hk, D)
    cubic = cubic.reshape(bs, m * hk, d)                   # (bs, m*hk, D)
    return jnp.einsum('oc,bcd->bod', w, cubic) + b[None, :, None]


if __name__ == "__main__":
    # Small shapes chosen so that both padding paths (bs not a multiple of the
    # batch block, hk not a multiple of 8) and a multi-step grid are exercised.
    bs, m, hk, d = 6, 4, 6, 128
    out_c = 8                      # h_{k+1}
    in_c = m * hk                  # Conv1d in_channels

    key = jax.random.PRNGKey(0)
    k0, k1, k2, k3 = jax.random.split(key, 4)

    x0 = jax.random.normal(k0, (bs, m, d), dtype=jnp.float32)
    xk = jax.random.normal(k1, (bs, hk, d), dtype=jnp.float32)

    # Deterministic Conv1d(kernel_size=1) parameter init (PyTorch-style uniform).
    bound = 1.0 / (in_c ** 0.5)
    w = jax.random.uniform(k2, (out_c, in_c), jnp.float32, -bound, bound)
    b = jax.random.uniform(k3, (out_c,), jnp.float32, -bound, bound)

    res = cin_layer(x0, xk, w, b, batch_block=4)   # 2 grid steps + batch padding
    res = jax.block_until_ready(res)

    ref = cin_reference(x0, xk, w, b)
    assert res.shape == (bs, out_c, d)
    assert jnp.allclose(res, ref, atol=1e-4, rtol=1e-4), "mismatch vs reference"

    print("KERNEL_OK")
</pallas_src>

<mosaic_0001>
module attributes {stable_mosaic.version = 11 : i64} {
  func.func @cin_kernel(%arg0: i32, %arg1: memref<4x4x128xf32, #tpu.memory_space<vmem>>, %arg2: memref<4x8x128xf32, #tpu.memory_space<vmem>>, %arg3: memref<8x32xf32, #tpu.memory_space<vmem>>, %arg4: memref<8x1xf32, #tpu.memory_space<vmem>>, %arg5: memref<4x8x128xf32, #tpu.memory_space<vmem>>) attributes {dimension_semantics = [#tpu.dimension_semantics<parallel>], iteration_bounds = array<i64: 2>, scalar_prefetch = 0 : i64, scratch_operands = 0 : i64, tpu.core_type = #tpu.core_type<tc>, window_params = [{transform_indices = @transform_0, window_bounds = array<i64: 4, 4, 128>}, {transform_indices = @transform_1, window_bounds = array<i64: 4, 8, 128>}, {pipeline_mode = #tpu.pipeline_mode<synchronous>, transform_indices = @transform_2, window_bounds = array<i64: 8, 32>}, {pipeline_mode = #tpu.pipeline_mode<synchronous>, transform_indices = @transform_3, window_bounds = array<i64: 8, 1>}, {transform_indices = @transform_4, window_bounds = array<i64: 4, 8, 128>}]} {
    %c0 = arith.constant 0 : index
    %c0_0 = arith.constant 0 : index
    %c0_1 = arith.constant 0 : index
    %0 = vector.load %arg1[%c0, %c0_0, %c0_1] : memref<4x4x128xf32, #tpu.memory_space<vmem>>, vector<4x4x128xf32>
    %c0_2 = arith.constant 0 : index
    %c0_3 = arith.constant 0 : index
    %c0_4 = arith.constant 0 : index
    %1 = vector.load %arg2[%c0_2, %c0_3, %c0_4] : memref<4x8x128xf32, #tpu.memory_space<vmem>>, vector<4x8x128xf32>
    %c0_5 = arith.constant 0 : index
    %c0_6 = arith.constant 0 : index
    %2 = vector.load %arg3[%c0_5, %c0_6] : memref<8x32xf32, #tpu.memory_space<vmem>>, vector<8x32xf32>
    %3 = vector.shape_cast %0 : vector<4x4x128xf32> to vector<4x4x1x128xf32>
    %4 = vector.shape_cast %1 : vector<4x8x128xf32> to vector<4x1x8x128xf32>
    %5 = vector.broadcast %3 : vector<4x4x1x128xf32> to vector<4x4x8x128xf32>
    %6 = vector.broadcast %4 : vector<4x1x8x128xf32> to vector<4x4x8x128xf32>
    %7 = arith.mulf %5, %6 : vector<4x4x8x128xf32>
    %8 = vector.shape_cast %7 : vector<4x4x8x128xf32> to vector<4x32x128xf32>
    %9 = vector.shape_cast %2 : vector<8x32xf32> to vector<1x8x32xf32>
    %10 = vector.shape_cast %9 : vector<1x8x32xf32> to vector<1x8x32xf32>
    %11 = vector.broadcast %10 : vector<1x8x32xf32> to vector<4x8x32xf32>
    "tpu.trace_start"() <{level = 10 : i32, message = "boc,bcd->bod"}> : () -> ()
    %cst = arith.constant dense<0.000000e+00> : vector<4x8x128xf32>
    %12 = tpu.matmul %11, %8, %cst {dimension_numbers = #tpu.dot_dimension_numbers<[2], [1], [1], [2], [0, 0, 0, 1, 1, 2], [0], [0]>} : vector<4x8x32xf32>, vector<4x32x128xf32>, vector<4x8x128xf32> -> vector<4x8x128xf32>
    "tpu.trace_stop"() : () -> ()
    %c0_7 = arith.constant 0 : index
    %c0_8 = arith.constant 0 : index
    %13 = vector.load %arg4[%c0_7, %c0_8] : memref<8x1xf32, #tpu.memory_space<vmem>>, vector<8x1xf32>
    %14 = vector.shape_cast %13 : vector<8x1xf32> to vector<1x8x1xf32>
    %15 = vector.broadcast %14 : vector<1x8x1xf32> to vector<4x8x128xf32>
    %16 = arith.addf %12, %15 : vector<4x8x128xf32>
    %c0_9 = arith.constant 0 : index
    %c0_10 = arith.constant 0 : index
    %c0_11 = arith.constant 0 : index
    %17 = vector.load %arg5[%c0_9, %c0_10, %c0_11] : memref<4x8x128xf32, #tpu.memory_space<vmem>>, vector<4x8x128xf32>
    tpu.vector_store %arg5[%c0_9, %c0_10, %c0_11], %16 {strides = array<i32>} : memref<4x8x128xf32, #tpu.memory_space<vmem>>, vector<4x8x128xf32>,
    return
  }
  func.func @transform_0(%arg0: i32) -> (i32, i32, i32) {
    %c0_i32 = arith.constant 0 : i32
    %c0_i32_0 = arith.constant 0 : i32
    %c0_i32_1 = arith.constant 0 : i32
    return %arg0, %c0_i32, %c0_i32_0 : i32, i32, i32
  }
  func.func @transform_1(%arg0: i32) -> (i32, i32, i32) {
    %c0_i32 = arith.constant 0 : i32
    %c0_i32_0 = arith.constant 0 : i32
    %c0_i32_1 = arith.constant 0 : i32
    return %arg0, %c0_i32, %c0_i32_0 : i32, i32, i32
  }
  func.func @transform_2(%arg0: i32) -> (i32, i32) {
    %c0_i32 = arith.constant 0 : i32
    %c0_i32_0 = arith.constant 0 : i32
    %c0_i32_1 = arith.constant 0 : i32
    return %c0_i32, %c0_i32_0 : i32, i32
  }
  func.func @transform_3(%arg0: i32) -> (i32, i32) {
    %c0_i32 = arith.constant 0 : i32
    %c0_i32_0 = arith.constant 0 : i32
    %c0_i32_1 = arith.constant 0 : i32
    return %c0_i32, %c0_i32_0 : i32, i32
  }
  func.func @transform_4(%arg0: i32) -> (i32, i32, i32) {
    %c0_i32 = arith.constant 0 : i32
    %c0_i32_0 = arith.constant 0 : i32
    %c0_i32_1 = arith.constant 0 : i32
    return %arg0, %c0_i32, %c0_i32_0 : i32, i32, i32
  }
}

</mosaic_0001>

<bundles_post_ra>
// kernel: tpu_custom_call.1
= control target key start
LH: loop header
LB: loop body
LE: loop exit
PB: predicated region body
PF: predicated region fallthrough
CT: control target
= control target key end

     0   :  { %9 = vsyncpa [#allocation3], 0  ;;  %s1491_s0 = inlined_call_operand.hbm [shape: f32[8,4,128], index: 0, kind: input, shape index: {}]   ;;  %s1492_s1 = inlined_call_operand.hbm [shape: f32[8,8,128], index: 1, kind: input, shape index: {}]   ;;  %s1493_s2 = inlined_call_operand.vmem [shape: f32[8,32], index: 2, kind: input, shape index: {}]   ;;  %s1494_s3 = inlined_call_operand.vmem [shape: f32[8,1], index: 3, kind: input, shape index: {}]   ;;  %s1495_s4 = inlined_call_operand.hbm [shape: f32[8,8,128], index: 4, kind: output, shape index: {}]  }
   0x1   :  { %11 = vsyncpa [#allocation3 + $0x1], 0 }
   0x2   :  { %12 = vsyncpa [#allocation6], 0 }
   0x3   :  { %14 = vsyncpa [#allocation6 + $0x1], 0 }
   0x4   :  { %15 = vsyncpa [#allocation4], 0 }
   0x5   :  { %17 = vsyncpa [#allocation4 + $0x1], 0  ;;  %s1219_s15 = smov 0   ;;  %s1221_s16 = smov 0  }
   0x6   :  { %s1223_s17 = smov 0   ;;  %s1225_s18 = smov 0  }
   0x7 LB: > { %s1240_s19 = sadd.s32 4294967295, %s1178_s18   ;;  %s868_s20 = sadd.s32 4294967294, %s1178_s18   ;;  %s1178_s18 = sphi %s1225_s18, %s1511_s18   ;;  %s1174_s17 = sphi %s1223_s17, %s1510_s17   ;;  %s1170_s16 = sphi %s1221_s16, %s1509_s16   ;;  %s1166_s15 = sphi %s1219_s15, %s1508_s15  }
   0x8   : > { %s1244_s21 = sadd.s32 1, %s1178_s18   ;;  %s30_s22 = sadd.s32 1, %s1174_s17 }
   0x9   : > { %s27_s23 = ssub.s32 %s1178_s18, %s1244_s21  ;;  %p37_p0 = scmp.ne.s32.totalorder %s1174_s17, %s1170_s16 }
   0xa   : > { %p28_p1 = scmp.eq.s32.totalorder %s27_s23, 0  ;;  %p38_p2 = scmp.eq.s32.totalorder %s1178_s18, 0 }
   0xb   : > { %p43_p3 = scmp.ne.s32.totalorder %s1170_s16, %s1166_s15  ;;  %p44_p4 = scmp.eq.s32.totalorder %s1240_s19, 0 }
   0xc   : > { %s1256_s24 = scalar_select %p28_p1, %s1174_s17, %s30_s22  }
   0xd   : > { %p1258_p5 = por %p38_p2, %p37_p0  ;;  %p1262_p6 = por %p44_p4, %p43_p3 }
   0xe   : > { %p135_p7 = scmp.eq.s32.totalorder %s1240_s19, 1  ;;  %p141_p8 = scmp.eq.s32.totalorder %s868_s20, 1 }
   0xf   : > { %s1499_s26 = scalar_select %p1262_p6, 1, 0 }
  0x10   : > { %p1002_p10 = scmp.lt.s32.totalorder %s1178_s18, 2  ;;  %p1269_p11 = por %p135_p7, %p37_p0 }
  0x11   : > { %p1273_p12 = por %p141_p8, %p43_p3  ;;  %s1278_s29 = sand.u32 1, %s1174_s17  }
  0x12   : > { %s1500_s27 = scalar_select %p1269_p11, 1, 0 }
  0x13   : > { %s1501_s28 = scalar_select %p1273_p12, 1, 0 }
  0x14   : > { %s894_s30 = sshll.u32 %s1178_s18, 8  ;;  %s871_s5 = sshll.u32 %s1278_s29, 4 }
  0x15   : > { %s1285_s8 = scalar_lea.hbm %s1491_s0, %s894_s30  ;;  %s171_s9 = scalar_lea.vmem [#allocation2], %s871_s5 }
  0x16   : > { %s178_s10 = sshll.u32 %s171_s9, 4  ;;  %p1289_p13 = pnand %p1002_p10, %p1258_p5  ;;  %s1293_s10 = int_to_ptr.vmem [resolvable:$true] %s178_s10 }
  0x17   : > { %s168_s12 = scalar_lea.sflag [#allocation3], %s1278_s29  ;;  %s1048_s13 = scalar_lea.hbm %s1285_s8, 256 }
  0x18   : > { %p1049_p0 = scmp.ne.s32.totalorder %s1285_s8, %s1048_s13  ;;  %p1050_p1 = pneg %p1289_p13 }
  0x19   : > { %s1053_s22 = scalar_lea.hbm %s1491_s0, 512  ;;  %p1054_p4 = scmp.lt.u32.totalorder %s1285_s8, %s1491_s0 }
  0x1a   : > { %p1051_p2 = pnand %p1050_p1, %p1049_p0  ;;  %p1055_p5 = scmp.lt.u32.totalorder %s1053_s22, %s1048_s13 }
  0x1b   : > { %p1057_p8 = scmp.lt.u32.totalorder %s1048_s13, %s1285_s8 }
  0x1c   : > { %p1052_p3 = pneg %p1051_p2  ;;  %p1056_p7 = por %p1055_p5, %p1054_p4 }
  0x1e   : > { %p1058_p10 = por %p1057_p8, %p1056_p7 }
  0x20   : > { %p1059_p9 = pnand %p1058_p10, %p1052_p3 }
  0x22   : > { %1062 = shalt.err (!%p1059_p9)
}
  0x23   : > { %s1063_s30 = scalar_lea.vmem %s1293_s10, 256  ;;  %s1180_s5 = smov [#allocation2]  }
  0x24   : > { %p1064_p0 = scmp.ne.s32.totalorder %s1293_s10, %s1063_s30  ;;  %s1068_s6 = sshll.u32 %s1180_s5, 4  ;;  %s1069_s6 = int_to_ptr.vmem [resolvable:$false] %s1068_s6 }
  0x25   : > { %s1070_s7 = scalar_lea.vmem %s1069_s6, 512  ;;  %p1071_p11 = scmp.lt.s32.totalorder %s1293_s10, %s1069_s6 }
  0x26   : > { %p1066_p2 = pnand %p1064_p0, %p1050_p1  ;;  %p1072_p4 = scmp.lt.s32.totalorder %s1070_s7, %s1063_s30 }
  0x28   : > { %p1067_p12 = pneg %p1066_p2  ;;  %p1073_p5 = por %p1072_p4, %p1071_p11 }
  0x2a   : > { %p1074_p7 = pnand %p1073_p5, %p1067_p12 }
  0x2c   : > { %1077 = shalt.err (!%p1074_p7)
}
  0x2d   : > { %s1181_s9 = smov 64   ;;  %s1182_s13 = smov 4  }
  0x2e   : > { %994 = dma.hbm_to_vmem [thread:$0]  (!%p1289_p13), %s1285_s8, 256, %s1293_s10, %s168_s12, %s1181_s9, %s1181_s9, %s1182_s13  }
  0x2f   : > { %p877_p9 = scmp.ge.s32.totalorder %s1178_s18, 1  ;;  %p207_p3 = scmp.lt.s32.totalorder %s1178_s18, 3 }
  0x30   : > { %s874_s14 = sshll.u32 %s1278_s29, 5  ;;  %s895_s22 = sshll.u32 %s1178_s18, 9 }
  0x31   : > { %p1326_p11 = pnand %p877_p9, %p207_p3  ;;  %s192_s23 = scalar_lea.vmem [#allocation5], %s874_s14 }
  0x32   : > { %s199_s25 = sshll.u32 %s192_s23, 4  ;;  %s1334_s6 = scalar_lea.hbm %s1492_s1, %s895_s22  ;;  %s1336_s25 = int_to_ptr.vmem [resolvable:$true] %s199_s25 }
  0x33   : > { %s189_s8 = scalar_lea.sflag [#allocation6], %s1278_s29  ;;  %s1078_s10 = scalar_lea.hbm %s1334_s6, 512 }
  0x34   : > { %p1079_p12 = scmp.ne.s32.totalorder %s1334_s6, %s1078_s10  ;;  %s1083_s9 = scalar_lea.hbm %s1492_s1, 1024 }
  0x35   : > { %p1084_p0 = scmp.lt.u32.totalorder %s1334_s6, %s1492_s1  ;;  %p1085_p2 = scmp.lt.u32.totalorder %s1083_s9, %s1078_s10 }
  0x36   : > { %p1081_p8 = pnand %p1079_p12, %p1050_p1  ;;  %p1087_p5 = scmp.lt.u32.totalorder %s1078_s10, %s1334_s6 }
  0x37   : > { %p1086_p4 = por %p1085_p2, %p1084_p0 }
  0x38   : > { %p1082_p10 = pneg %p1081_p8 }
  0x39   : > { %p1088_p7 = por %p1087_p5, %p1086_p4 }
  0x3b   : > { %p1089_p9 = pnand %p1088_p7, %p1082_p10 }
  0x3d   : > { %1092 = shalt.err (!%p1089_p9)
}
  0x3e   : > { %s1093_s22 = scalar_lea.vmem %s1336_s25, 512  ;;  %s1183_s23 = smov [#allocation5]  }
  0x3f   : > { %p1094_p3 = scmp.ne.s32.totalorder %s1336_s25, %s1093_s22  ;;  %s1098_s30 = sshll.u32 %s1183_s23, 4  ;;  %s1099_s30 = int_to_ptr.vmem [resolvable:$false] %s1098_s30 }
  0x40   : > { %s1100_s5 = scalar_lea.vmem %s1099_s30, 1024  ;;  %p1101_p6 = scmp.lt.s32.totalorder %s1336_s25, %s1099_s30 }
  0x41   : > { %p1096_p12 = pnand %p1094_p3, %p1050_p1  ;;  %p1102_p0 = scmp.lt.s32.totalorder %s1100_s5, %s1093_s22 }
  0x43   : > { %p1097_p8 = pneg %p1096_p12  ;;  %p1103_p2 = por %p1102_p0, %p1101_p6 }
  0x45   : > { %p1104_p4 = pnand %p1103_p2, %p1097_p8 }
  0x47   : > { %1107 = shalt.err (!%p1104_p4)
}
  0x48   : > { %s1184_s10 = smov 128   ;;  %s1185_s12 = smov 8  }
  0x49   : > { %997 = dma.hbm_to_vmem [thread:$0]  (!%p1289_p13), %s1334_s6, 512, %s1336_s25, %s189_s8, %s1184_s10, %s1184_s10, %s1185_s12  }
  0x4a   : > { %211 = sbr.rel (%p1326_p11) target bundleno = 345 (0x159), region = 36  ;;  %s1367_s7 = sand.u32 (!%p1326_p11), 1, %s1170_s16  }
  0x4b   : > { %s878_s9 = sshll.u32 (!%p1326_p11), %s1367_s7, 4  ;;  %s214_s13 = scalar_lea.sflag (!%p1326_p11), [#allocation3], %s1367_s7 }
  0x4c   : > { %s1371_s14 = scalar_lea.vmem (!%p1326_p11), [#allocation2], %s878_s9  ;;  %p1504_p6 = scmp.ne.s32.totalorder (!%p1326_p11), %s1499_s26, 0 }
  0x51   : > { %1153 = dma.done.wait (%p1504_p6), %s214_s13, 256  }
  0x52   : > { %1155 = vsyncadd (%p1504_p6), %s214_s13, 4294967040  ;;  %s879_s29 = sshll.u32 %s1367_s7, 5  ;;  %s223_s11 = scalar_lea.sflag [#allocation6], %s1367_s7 }
  0x53   : > { %s1381_s20 = scalar_lea.vmem [#allocation5], %s879_s29 }
  0x54   : > { %1157 = dma.done.wait (%p1504_p6), %s223_s11, 512  }
  0x55   : > { %1159 = vsyncadd (%p1504_p6), %s223_s11, 4294966784  ;;  %v283_v0 = vlaneseq  ;;  %v1186_v1 = vmov 0.0|0.0   ;;  %v1187_v2 = vmov 1966171168   ;;  %vm1188_vm0 = vmmov 0   ;;  %v263_v14 = vld [vmem:[%s1381_s20] sm:$0xff] }
  0x56   : > { %961 = vmatprep.subr.bf16.mxu0 %v1186_v1  ;;  %967 = vmatprep.subr.bf16.mxu1 %v1186_v1  ;;  %v281_v3 = vunpack.c.l.s4 %v1187_v2  ;;  %v1189_v5 = vmov 0.0   ;;  %v1190_v7 = vmov 0   ;;  %v881_v10 = vld.sshfl [vmem:[%s1371_s14] sm:$0x33 pattern:$0x75316420] }
  0x57   : > { %v284_v4 = vshrl.u32 %v283_v0, 7  ;;  %925 = vmatprep.mubr.msk.f32.mxu0 %vm1188_vm0, %v1189_v5  ;;  %936 = vmatprep.mubr.msk.f32.mxu1 %vm1188_vm0, %v1189_v5  ;;  %v279_v11 = vcombine.high %v881_v10, %v881_v10  ;;  %v882_v13 = vld.sshfl [vmem:[%s1371_s14 + $0x4] sm:$0x33 pattern:$0x75316420]  ;;  %v264_v22 = vld [vmem:[%s1381_s20 + $0x8] sm:$0xff] }
  0x58   : > { %v282_v6 = vunpack.c.0.s8 %v281_v3  ;;  %1047 = vset.pattern.permute.xlu0 %v1190_v7  ;;  %v303_v15 = vcombine.high %v882_v13, %v882_v13  ;;  %v883_v17 = vld.sshfl [vmem:[%s1371_s14 + $0x8] sm:$0x33 pattern:$0x75316420]  ;;  %v464_v18 = vld [vmem:[%s1494_s3] sm:$0xff]  ;;  %v265_v40 = vld [vmem:[%s1381_s20 + $0x10] sm:$0xff] }
  0x59   : > { %v1393_v9 = vsub.s32 0, %v284_v4  ;;  %v327_v23 = vcombine.high %v883_v17, %v883_v17  ;;  %467 = vperm.xlu0 %1047, %v464_v18   ;;  %v884_v36 = vld.sshfl [vmem:[%s1371_s14 + $0xc] sm:$0x33 pattern:$0x75316420]  ;;  %vm470_vm1 = vcmask 261120  }
  0x5a   : > { %v285_v8 = vsub.s32 %v282_v6, %v284_v4  ;;  %v351_v49 = vcombine.high %v884_v36, %v884_v36  ;;  %v266_v56 = vld [vmem:[%s1381_s20 + $0x18] sm:$0xff]  ;;  %v267_v6 = vld [vmem:[%s1493_s2] sm:$0xff]  ;;  %s255_s22 = scalar_lea.vmem [#allocation7], %s879_s29  ;;  %s896_s30 = sshll.u32 %s1240_s19, 9 }
  0x5b   : > { %s772_s23 = sshll.u32 %s255_s22, 4  ;;  %s1447_s12 = scalar_lea.hbm %s1495_s4, %s896_s30  ;;  %s1442_s23 = int_to_ptr.vmem [resolvable:$true] %s772_s23 }
  0x5c   : > { %v286_v12 = vrot.slane %v881_v10, %v285_v8  ;;  %v310_v16 = vrot.slane %v882_v13, %v285_v8  ;;  %v293_v19 = vrot.slane %v279_v11, %v285_v8  ;;  %v317_v24 = vrot.slane %v303_v15, %v285_v8  ;;  %s759_s9 = scalar_lea.sflag [#allocation4], %s1367_s7  ;;  %s1108_s19 = scalar_lea.vmem %s1442_s23, 512 }
  0x5d   : > { %v334_v27 = vrot.slane %v883_v17, %v285_v8  ;;  %v341_v41 = vrot.slane %v327_v23, %v285_v8  ;;  %v358_v53 = vrot.slane %v884_v36, %v285_v8  ;;  %v365_v57 = vrot.slane %v351_v49, %v285_v8  ;;  %p1109_p13 = scmp.ne.s32.totalorder %s1442_s23, %s1108_s19  ;;  %p1505_p1 = scmp.ne.s32.totalorder %s1500_s27, 0 }
  0x5e   : > { %v294_v20 = vcombine.high %v286_v12, %v286_v12  ;;  %v371_v21 = vrot.slane %v286_v12, %v1393_v9  ;;  %v318_v25 = vcombine.high %v310_v16, %v310_v16  ;;  %v387_v26 = vrot.slane %v310_v16, %v1393_v9  ;;  %s1191_s13 = smov [#allocation7]  }
  0x5f   : > { %v295_v28 = vcombine.high %v293_v19, %v293_v19  ;;  %v375_v29 = vrot.slane %v293_v19, %v1393_v9  ;;  %v319_v32 = vcombine.high %v317_v24, %v317_v24  ;;  %v391_v33 = vrot.slane %v317_v24, %v1393_v9  ;;  %p1110_p11 = pnand %p1109_p13, %p1505_p1  ;;  %s1112_s14 = sshll.u32 %s1191_s13, 4  ;;  %s1113_s14 = int_to_ptr.vmem [resolvable:$false] %s1112_s14 }
  0x60   : > { %v448_v30 = vmul.f32 %v371_v21, %v263_v14  ;;  %v379_v31 = vrot.slane %v294_v20, %v1393_v9  ;;  %v452_v34 = vmul.f32 %v387_v26, %v264_v22  ;;  %v395_v35 = vrot.slane %v318_v25, %v1393_v9  ;;  %s1114_s29 = scalar_lea.vmem %s1113_s14, 1024  ;;  %p1115_p5 = scmp.lt.s32.totalorder %s1442_s23, %s1113_s14 }
  0x61   : > { %v449_v37 = vmul.f32 %v375_v29, %v263_v14  ;;  %v383_v38 = vrot.slane %v295_v28, %v1393_v9  ;;  %v453_v42 = vmul.f32 %v391_v33, %v264_v22  ;;  %v399_v43 = vrot.slane %v319_v32, %v1393_v9  ;;  %p1111_p10 = pneg %p1110_p11  ;;  %p1116_p7 = scmp.lt.s32.totalorder %s1114_s29, %s1108_s19 }
  0x62   : > { %v450_v39 = vmul.f32 %v379_v31, %v263_v14  ;;  %v454_v44 = vmul.f32 %v395_v35, %v264_v22  ;;  %v403_v45 = vrot.slane %v334_v27, %v1393_v9  ;;  %v407_v48 = vrot.slane %v341_v41, %v1393_v9 }
  0x63   : > { %v962_v46 = vpack.c.bf16 %v449_v37, %v448_v30  ;;  %v451_v47 = vmul.f32 %v383_v38, %v263_v14  ;;  %v968_v50 = vpack.c.bf16 %v453_v42, %v452_v34  ;;  %v455_v51 = vmul.f32 %v399_v43, %v264_v22  ;;  %p1117_p9 = por %p1116_p7, %p1115_p5 }
  0x64   : > { %v456_v52 = vmul.f32 %v403_v45, %v265_v40  ;;  %v457_v55 = vmul.f32 %v407_v48, %v265_v40  ;;  %v342_v58 = vcombine.high %v334_v27, %v334_v27  ;;  %v419_v60 = vrot.slane %v358_v53, %v1393_v9 }
  0x65   : > { %963 = vmatpush3.bf16.msra.mxu0 %v962_v46  ;;  %v965_v54 = vpack.c.bf16 %v451_v47, %v450_v39  ;;  %969 = vmatpush3.bf16.msra.mxu1 %v968_v50  ;;  %v971_v59 = vpack.c.bf16 %v455_v51, %v454_v44  ;;  %v343_v61 = vcombine.high %v341_v41, %v341_v41  ;;  %p1118_p3 = pnand %p1117_p9, %p1111_p10 }
  0x66   : > { %964 = vmatprep.subr.bf16.mxu0 %v1186_v1  ;;  %970 = vmatprep.subr.bf16.mxu1 %v1186_v1  ;;  %v423_v62 = vrot.slane %v365_v57, %v1393_v9  ;;  %v411_v63 = vrot.slane %v342_v58, %v1393_v9  ;;  %v366_v0 = vcombine.high %v358_v53, %v358_v53 }
  0x67   : > { %v460_v2 = vmul.f32 %v419_v60, %v266_v56  ;;  %v415_v3 = vrot.slane %v343_v61, %v1393_v9  ;;  %v367_v4 = vcombine.high %v365_v57, %v365_v57  ;;  %v974_v7 = vpack.c.bf16 %v457_v55, %v456_v52 }
  0x68   : > { %v461_v8 = vmul.f32 %v423_v62, %v266_v56  ;;  %v458_v10 = vmul.f32 %v411_v63, %v265_v40  ;;  %v427_v11 = vrot.slane %v366_v0, %v1393_v9 }
  0x69   : > { %966 = vmatpush3.bf16.msra.mxu0 %v965_v54  ;;  %972 = vmatpush3.bf16.msra.mxu1 %v971_v59  ;;  %v459_v12 = vmul.f32 %v415_v3, %v265_v40  ;;  %v431_v13 = vrot.slane %v367_v4, %v1393_v9 }
  0x6a   : > { %973 = vmatprep.subr.bf16.mxu0 %v1186_v1  ;;  %979 = vmatprep.subr.bf16.mxu1 %v1186_v1  ;;  %v980_v14 = vpack.c.bf16 %v461_v8, %v460_v2  ;;  %v462_v15 = vmul.f32 %v427_v11, %v266_v56 }
  0x6b   : > { %v463_v16 = vmul.f32 %v431_v13, %v266_v56  ;;  %v977_v17 = vpack.c.bf16 %v459_v12, %v458_v10 }
  0x6c   : > { %926 = vmatmul.mubr.msk.f32.vlgmr.msra.gmra.mrb[0].mxu0 %vm470_vm1, %v267_v6  ;;  %937 = vmatmul.mubr.msk.f32.vlgmr.msra.gmra.mrb[0].mxu1 %vm470_vm1, %v267_v6 }
  0x6d   : > { %975 = vmatpush3.bf16.msra.mxu0 %v974_v7  ;;  %981 = vmatpush3.bf16.msra.mxu1 %v980_v14  ;;  %v983_v18 = vpack.c.bf16 %v463_v16, %v462_v15 }
  0x6e   : > { %976 = vmatprep.subr.bf16.mxu0 %v1186_v1  ;;  %982 = vmatprep.subr.bf16.mxu1 %v1186_v1 }
  0x6f   : > { %947 = vmatprep.mubr.msk.f32.mxu0 %vm1188_vm0, %v1189_v5  ;;  %958 = vmatprep.mubr.msk.f32.mxu1 %vm1188_vm0, %v1189_v5 }
  0x71   : > { %978 = vmatpush3.bf16.msra.mxu0 %v977_v17  ;;  %984 = vmatpush3.bf16.msra.mxu1 %v983_v18 }
  0x74   : > { %948 = vmatmul.mubr.msk.f32.vlgmr.msra.gmra.mrb[2].mxu0 %vm470_vm1, %v267_v6  ;;  %959 = vmatmul.mubr.msk.f32.vlgmr.msra.gmra.mrb[2].mxu1 %vm470_vm1, %v267_v6 }
  0xd8   : > { %v468_v9 = vpop.permute.xlu0 %467 }
 0x13f   : > { %v540_v19 = vpop.f32.mrb[0].mxu0  ;;  %v610_v20 = vpop.f32.mrb[0].mxu1 }
 0x140   : > { %v541_v21 = vadd.f32 %v540_v19, %v468_v9  ;;  %v927_v22 = vpop.f32.mrb[1].mxu0  ;;  %v611_v23 = vadd.f32 %v610_v20, %v468_v9  ;;  %v938_v1 = vpop.f32.mrb[1].mxu1 }
 0x142   : > { %754 = vst [vmem:[%s255_s22] sm:$0xff] %v541_v21  ;;  %755 = vst [vmem:[%s255_s22 + $0x8] sm:$0xff] %v611_v23 }
 0x147   : > { %v680_v5 = vpop.f32.mrb[2].mxu0  ;;  %v750_v25 = vpop.f32.mrb[2].mxu1 }
 0x148   : > { %v681_v24 = vadd.f32 %v680_v5, %v468_v9  ;;  %v949_v26 = vpop.f32.mrb[3].mxu0  ;;  %v751_v27 = vadd.f32 %v750_v25, %v468_v9  ;;  %v960_v28 = vpop.f32.mrb[3].mxu1 }
 0x14a   : > { %756 = vst [vmem:[%s255_s22 + $0x10] sm:$0xff] %v681_v24  ;;  %757 = vst [vmem:[%s255_s22 + $0x18] sm:$0xff] %v751_v27 }
 0x14b   : > { %1121 = shalt.err (!%p1118_p3)
}
 0x14c   : > { %s1122_s11 = scalar_lea.hbm %s1447_s12, 512  ;;  %s1126_s25 = scalar_lea.hbm %s1495_s4, 1024 }
 0x14d   : > { %p1123_p12 = scmp.ne.s32.totalorder %s1447_s12, %s1122_s11  ;;  %p1127_p2 = scmp.lt.u32.totalorder %s1447_s12, %s1495_s4 }
 0x14e   : > { %p1128_p4 = scmp.lt.u32.totalorder %s1126_s25, %s1122_s11  ;;  %p1130_p13 = scmp.lt.u32.totalorder %s1122_s11, %s1447_s12 }
 0x14f   : > { %p1124_p8 = pnand %p1123_p12, %p1505_p1 }
 0x150   : > { %p1129_p6 = por %p1128_p4, %p1127_p2 }
 0x151   : > { %p1125_p0 = pneg %p1124_p8 }
 0x152   : > { %p1131_p11 = por %p1130_p13, %p1129_p6 }
 0x154   : > { %p1132_p10 = pnand %p1131_p11, %p1125_p0 }
 0x156   : > { %1135 = shalt.err (!%p1132_p10)
}
 0x157   : > { %s1192_s22 = smov 128   ;;  %s1193_s30 = smov 8  }
 0x158   : > { %989 = dma.vmem_to_hbm [thread:$0]  (%p1505_p1), %s1442_s23, 512, %s1447_s12, %s759_s9, %s1192_s22, %s1192_s22, %s1193_s30  }
 0x159 PF: > { %s787_s5 = sand.u32 1, %s1166_s15   ;;  %p1506_p5 = scmp.ne.s32.totalorder %s1501_s28, 0 }
 0x15a   : > { %p1507_p7 = scmp.ge.s32.totalorder %s1178_s18, 2  ;;  %s788_s10 = scalar_lea.sflag [#allocation4], %s787_s5 }
 0x15c   : > { %p999_p9 = pnand %p1507_p7, %p1506_p5 }
 0x15e   : > { %1161 = dma.done.wait (!%p999_p9), %s788_s10, 512  }
 0x15f   : > { %1163 = vsyncadd (!%p999_p9), %s788_s10, 4294966784  ;;  %p20_p3 = scmp.ge.s32.totalorder %s1244_s21, 4   ;;  %s1508_s15 = smov %s1170_s16 }
 0x160   : > { %s1509_s16 = smov %s1174_s17  ;;  %s1510_s17 = smov %s1256_s24 }
 0x161   : > { %s1511_s18 = smov %s1244_s21  ;;  %22 = sbr.rel (!%p20_p3) target bundleno = 7 (0x7), region = 94 }
 0x168   :  { %793 = vsyncpa [#allocation3], 1 }
 0x169   :  { %795 = vsyncpa [#allocation3 + $0x1], 1 }
 0x16a   :  { %796 = vsyncpa [#allocation6], 1 }
 0x16b   :  { %798 = vsyncpa [#allocation6 + $0x1], 1 }
 0x16c   :  { %799 = vsyncpa [#allocation4], 1 }
 0x16d   :  { %801 = vsyncpa [#allocation4 + $0x1], 1 }

</bundles_post_ra>
